<compile_context>
chip_gen: v7x
topology: tpu7x:2x2x1
jax: 0.10.0
libtpu: 0.0.40
codegen_flags: <defaults>
</compile_context>

<pallas_src>
import functools

import jax
import jax.numpy as jnp
from jax.experimental import pallas as pl
from jax.experimental.pallas import tpu as pltpu

HIDDEN = 256  # fixed in Shield.__init__


def _round_up(x, m):
    return (x + m - 1) // m * m


# --------------------------------------------------------------------------
# Kernels
# --------------------------------------------------------------------------
def _mlp_tail(h, w2_ref, b2_ref, w3_ref, b3_ref, w4row_ref, b4_ref, o_ref):
    """Layers 2-4 (shared by discrete / continuous kernels). h is f32 (blk, HIDDEN)."""
    cdt = w2_ref.dtype
    h = jnp.dot(h.astype(cdt), w2_ref[...], preferred_element_type=jnp.float32)
    h = jnp.maximum(h + b2_ref[...], 0.0)

    h = jnp.dot(h.astype(cdt), w3_ref[...], preferred_element_type=jnp.float32)
    h = jnp.maximum(h + b3_ref[...], 0.0)

    # HIDDEN -> 1: VPU multiply + cross-lane reduce (avoid an N=1 MXU matmul).
    y = jnp.sum(h * w4row_ref[...], axis=-1, keepdims=True) + b4_ref[...]
    o_ref[...] = jax.nn.sigmoid(y).astype(o_ref.dtype)


def _shield_kernel_discrete(s_ref, a_ref, w1s_ref, w1a_ref, b1_ref,
                            w2_ref, b2_ref, w3_ref, b3_ref,
                            w4row_ref, b4_ref, o_ref):
    # Identity embedding + concat + matmul  ==  s @ W1[:S] + onehot(a) @ W1[S:]
    # One-hot built in-kernel from the int32 action tile (no HBM row gather).
    blk = s_ref.shape[0]
    action_dim = w1a_ref.shape[0]
    lane_ids = jax.lax.broadcasted_iota(jnp.int32, (blk, action_dim), 1)
    onehot = (lane_ids == a_ref[...]).astype(w1a_ref.dtype)      # (blk, action_dim)

    h = (jnp.dot(s_ref[...], w1s_ref[...], preferred_element_type=jnp.float32)
         + jnp.dot(onehot, w1a_ref[...], preferred_element_type=jnp.float32))
    h = jnp.maximum(h + b1_ref[...], 0.0)
    _mlp_tail(h, w2_ref, b2_ref, w3_ref, b3_ref, w4row_ref, b4_ref, o_ref)


def _shield_kernel_continuous(s_ref, a_ref, w1s_ref, w1a_ref, b1_ref,
                              w2_ref, b2_ref, w3_ref, b3_ref,
                              w4row_ref, b4_ref, o_ref):
    # Layer 1 as two matmuls against the split W1 (no concat).
    h = (jnp.dot(s_ref[...], w1s_ref[...], preferred_element_type=jnp.float32)
         + jnp.dot(a_ref[...], w1a_ref[...], preferred_element_type=jnp.float32))
    h = jnp.maximum(h + b1_ref[...], 0.0)
    _mlp_tail(h, w2_ref, b2_ref, w3_ref, b3_ref, w4row_ref, b4_ref, o_ref)


# --------------------------------------------------------------------------
# Params
# --------------------------------------------------------------------------
def init_shield_params(key, state_dim, action_dim, has_continuous_action_space):
    """Deterministic parameter init matching torch.nn.Linear default
    (uniform in +-1/sqrt(fan_in)). Weights stored as (in, out), f32."""
    in_dim = state_dim + action_dim
    dims = [(in_dim, HIDDEN), (HIDDEN, HIDDEN), (HIDDEN, HIDDEN), (HIDDEN, 1)]
    params = {}
    keys = jax.random.split(key, 2 * len(dims))
    for i, (fan_in, fan_out) in enumerate(dims):
        bound = 1.0 / jnp.sqrt(jnp.float32(fan_in))
        w = jax.random.uniform(keys[2 * i], (fan_in, fan_out),
                               minval=-bound, maxval=bound, dtype=jnp.float32)
        b = jax.random.uniform(keys[2 * i + 1], (1, fan_out),
                               minval=-bound, maxval=bound, dtype=jnp.float32)
        params[f"w{i + 1}"] = w
        params[f"b{i + 1}"] = b
    if not has_continuous_action_space:
        # action_embedding.weight.data = torch.eye(action_dim)
        params["action_embedding"] = jnp.eye(action_dim, dtype=jnp.float32)
    return params


def prepare_shield_params(params, state_dim, compute_dtype=jnp.bfloat16):
    """One-time preprocessing: split W1 and pre-cast matmul weights to the
    compute dtype so the per-call path carries no weight converts.
    compute_dtype=bf16 is the production default; use f32 for exact checks."""
    w1 = params["w1"]
    return dict(
        w1s=w1[:state_dim].astype(compute_dtype),   # (state_dim, HIDDEN)
        w1a=w1[state_dim:].astype(compute_dtype),   # (action_dim, HIDDEN)
        b1=params["b1"].astype(jnp.float32),
        w2=params["w2"].astype(compute_dtype),
        b2=params["b2"].astype(jnp.float32),
        w3=params["w3"].astype(compute_dtype),
        b3=params["b3"].astype(jnp.float32),
        w4row=params["w4"].T.astype(jnp.float32),   # (1, HIDDEN) lane row for VPU reduce
        b4=params["b4"].astype(jnp.float32),        # (1, 1)
    )


# --------------------------------------------------------------------------
# Forward
# --------------------------------------------------------------------------
@functools.partial(jax.jit, static_argnames=("has_continuous_action_space", "block_b"))
def shield_forward(prepared, s, a, *, has_continuous_action_space=False,
                   block_b=1024):
    """Shield.forward(s, a) -> sigmoid probs of shape (B, 1).

    `prepared` comes from prepare_shield_params.  block_b is the batch tile;
    on v7x, keep it small enough that the grid has >= 2 steps for large
    batches so both TensorCores are used (default 1024 gives that for B>1024).
    """
    B, state_dim = s.shape
    cdt = prepared["w1s"].dtype
    # Sublane-packing multiple for the compute dtype (f32: 8, bf16: 16, int8/fp8: 32).
    mult = {4: 8, 2: 16, 1: 32}[jnp.dtype(cdt).itemsize]

    blk = min(block_b, _round_up(B, mult))
    blk = _round_up(blk, mult)
    grid = (pl.cdiv(B, blk),)   # partial last block clipped by Pallas; no batch padding

    s_in = s.astype(cdt)

    full = lambda i: (0, 0)
    tile = lambda i: (i, 0)

    w1a = prepared["w1a"]
    action_dim = w1a.shape[0]

    # Weights use constant index maps -> resident in VMEM across grid steps.
    weight_specs = [
        pl.BlockSpec((state_dim, HIDDEN), full),     # w1[:S]
        pl.BlockSpec((action_dim, HIDDEN), full),    # w1[S:]
        pl.BlockSpec((1, HIDDEN), full),             # b1
        pl.BlockSpec((HIDDEN, HIDDEN), full),        # w2
        pl.BlockSpec((1, HIDDEN), full),             # b2
        pl.BlockSpec((HIDDEN, HIDDEN), full),        # w3
        pl.BlockSpec((1, HIDDEN), full),             # b3
        pl.BlockSpec((1, HIDDEN), full),             # w4 (row)
        pl.BlockSpec((1, 1), full),                  # b4
    ]
    weight_args = (prepared["w1s"], w1a, prepared["b1"],
                   prepared["w2"], prepared["b2"],
                   prepared["w3"], prepared["b3"],
                   prepared["w4row"], prepared["b4"])

    if has_continuous_action_space:
        a_in = a.astype(cdt)                              # (B, action_dim)
        a_spec = pl.BlockSpec((blk, action_dim), tile)
        kernel = _shield_kernel_continuous
    else:
        a_in = a.reshape(B, 1).astype(jnp.int32)          # (B, 1) int32, ~4 B/sample
        a_spec = pl.BlockSpec((blk, 1), tile)
        kernel = _shield_kernel_discrete

    out = pl.pallas_call(
        kernel,
        out_shape=jax.ShapeDtypeStruct((B, 1), jnp.float32),
        grid=grid,
        in_specs=[pl.BlockSpec((blk, state_dim), tile), a_spec] + weight_specs,
        out_specs=pl.BlockSpec((blk, 1), tile),
        compiler_params=pltpu.CompilerParams(
            dimension_semantics=("parallel",)),
    )(s_in, a_in, *weight_args)
    return out


# --------------------------------------------------------------------------
# Reference + tests
# --------------------------------------------------------------------------
def _reference_forward(params, s, a, has_continuous_action_space=False):
    """Pure-JAX reference for correctness checking (f32 everywhere)."""
    if has_continuous_action_space:
        a_enc = a.astype(jnp.float32)
    else:
        a_enc = params["action_embedding"][a]
    x = jnp.concatenate([s.astype(jnp.float32), a_enc], axis=-1)
    h = jnp.maximum(x @ params["w1"] + params["b1"], 0.0)
    h = jnp.maximum(h @ params["w2"] + params["b2"], 0.0)
    h = jnp.maximum(h @ params["w3"] + params["b3"], 0.0)
    return jax.nn.sigmoid(h @ params["w4"] + params["b4"])


if __name__ == "__main__":
    key = jax.random.PRNGKey(0)
    k_param, k_s, k_a, k_ac, k_s2, k_a2 = jax.random.split(key, 6)

    state_dim = 16
    action_dim = 8
    batch = 8

    s = jax.random.normal(k_s, (batch, state_dim), dtype=jnp.float32)

    # --- discrete-action path ---
    params_d = init_shield_params(k_param, state_dim, action_dim, False)
    a = jax.random.randint(k_a, (batch,), 0, action_dim, dtype=jnp.int32)
    ref_d = _reference_forward(params_d, s, a, False)

    # f32 compute: exact vs reference
    prep_f32 = prepare_shield_params(params_d, state_dim, jnp.float32)
    out_f32 = jax.block_until_ready(
        shield_forward(prep_f32, s, a, has_continuous_action_space=False))
    assert out_f32.shape == (batch, 1)
    assert jnp.allclose(out_f32, ref_d, atol=1e-5, rtol=1e-5), "f32 mismatch vs reference"

    # bf16 compute (production default): loose tolerance
    prep_bf16 = prepare_shield_params(params_d, state_dim, jnp.bfloat16)
    out_bf16 = jax.block_until_ready(
        shield_forward(prep_bf16, s, a, has_continuous_action_space=False))
    assert jnp.allclose(out_bf16, ref_d, atol=2e-2, rtol=0.0), "bf16 mismatch vs reference"

    # ragged multi-tile batch (exercises partial last block, no wrapper padding)
    B2 = 72
    s2 = jax.random.normal(k_s2, (B2, state_dim), dtype=jnp.float32)
    a2 = jax.random.randint(k_a2, (B2,), 0, action_dim, dtype=jnp.int32)
    out2 = jax.block_until_ready(
        shield_forward(prep_bf16, s2, a2, has_continuous_action_space=False, block_b=32))
    ref2 = _reference_forward(params_d, s2, a2, False)
    assert out2.shape == (B2, 1)
    assert jnp.allclose(out2, ref2, atol=2e-2, rtol=0.0), "ragged-batch mismatch vs reference"

    # --- continuous-action path ---
    params_c = init_shield_params(k_param, state_dim, action_dim, True)
    prep_c = prepare_shield_params(params_c, state_dim, jnp.float32)
    a_cont = jax.random.normal(k_ac, (batch, action_dim), dtype=jnp.float32)
    out_c = jax.block_until_ready(
        shield_forward(prep_c, s, a_cont, has_continuous_action_space=True))
    ref_c = _reference_forward(params_c, s, a_cont, True)
    assert jnp.allclose(out_c, ref_c, atol=1e-5, rtol=1e-5), "continuous mismatch vs reference"

    # TODO(synk): Shield.loss (BCELoss training objective) is not part of forward and is not implemented.
    print("KERNEL_OK")
</pallas_src>

<mosaic_0001>
module attributes {stable_mosaic.version = 11 : i64} {
  func.func @_shield_kernel_discrete(%arg0: i32, %arg1: memref<8x16xf32, #tpu.memory_space<vmem>>, %arg2: memref<8x1xi32, #tpu.memory_space<vmem>>, %arg3: memref<16x256xf32, #tpu.memory_space<vmem>>, %arg4: memref<8x256xf32, #tpu.memory_space<vmem>>, %arg5: memref<1x256xf32, #tpu.memory_space<vmem>>, %arg6: memref<256x256xf32, #tpu.memory_space<vmem>>, %arg7: memref<1x256xf32, #tpu.memory_space<vmem>>, %arg8: memref<256x256xf32, #tpu.memory_space<vmem>>, %arg9: memref<1x256xf32, #tpu.memory_space<vmem>>, %arg10: memref<1x256xf32, #tpu.memory_space<vmem>>, %arg11: memref<1x1xf32, #tpu.memory_space<vmem>>, %arg12: memref<8x1xf32, #tpu.memory_space<vmem>>) attributes {dimension_semantics = [#tpu.dimension_semantics<parallel>], iteration_bounds = array<i64: 1>, scalar_prefetch = 0 : i64, scratch_operands = 0 : i64, tpu.core_type = #tpu.core_type<tc>, window_params = [{transform_indices = @transform_0, window_bounds = array<i64: 8, 16>}, {transform_indices = @transform_1, window_bounds = array<i64: 8, 1>}, {pipeline_mode = #tpu.pipeline_mode<synchronous>, transform_indices = @transform_2, window_bounds = array<i64: 16, 256>}, {pipeline_mode = #tpu.pipeline_mode<synchronous>, transform_indices = @transform_3, window_bounds = array<i64: 8, 256>}, {pipeline_mode = #tpu.pipeline_mode<synchronous>, transform_indices = @transform_4, window_bounds = array<i64: 1, 256>}, {pipeline_mode = #tpu.pipeline_mode<synchronous>, transform_indices = @transform_5, window_bounds = array<i64: 256, 256>}, {pipeline_mode = #tpu.pipeline_mode<synchronous>, transform_indices = @transform_6, window_bounds = array<i64: 1, 256>}, {pipeline_mode = #tpu.pipeline_mode<synchronous>, transform_indices = @transform_7, window_bounds = array<i64: 256, 256>}, {pipeline_mode = #tpu.pipeline_mode<synchronous>, transform_indices = @transform_8, window_bounds = array<i64: 1, 256>}, {pipeline_mode = #tpu.pipeline_mode<synchronous>, transform_indices = @transform_9, window_bounds = array<i64: 1, 256>}, {pipeline_mode = #tpu.pipeline_mode<synchronous>, transform_indices = @transform_10, window_bounds = array<i64: 1, 1>}, {transform_indices = @transform_11, window_bounds = array<i64: 8, 1>}]} {
    %0 = tpu.iota {dimensions = array<i32: 1>} : vector<8x8xi32>
    %c0 = arith.constant 0 : index
    %c0_0 = arith.constant 0 : index
    %1 = vector.load %arg2[%c0, %c0_0] : memref<8x1xi32, #tpu.memory_space<vmem>>, vector<8x1xi32>
    %2 = vector.broadcast %1 : vector<8x1xi32> to vector<8x8xi32>
    %3 = arith.cmpi eq, %0, %2 : vector<8x8xi32>
    %4 = arith.extui %3 : vector<8x8xi1> to vector<8x8xi32>
    %5 = arith.sitofp %4 : vector<8x8xi32> to vector<8x8xf32>
    %c0_1 = arith.constant 0 : index
    %c0_2 = arith.constant 0 : index
    %6 = vector.load %arg1[%c0_1, %c0_2] : memref<8x16xf32, #tpu.memory_space<vmem>>, vector<8x16xf32>
    %c0_3 = arith.constant 0 : index
    %c0_4 = arith.constant 0 : index
    %7 = vector.load %arg3[%c0_3, %c0_4] : memref<16x256xf32, #tpu.memory_space<vmem>>, vector<16x256xf32>
    %cst = arith.constant dense<0.000000e+00> : vector<8x256xf32>
    %8 = tpu.matmul %6, %7, %cst {dimension_numbers = #tpu.dot_dimension_numbers<[1], [0], [0], [1], [0, 0, 1, 1], [], []>} : vector<8x16xf32>, vector<16x256xf32>, vector<8x256xf32> -> vector<8x256xf32>
    %c0_5 = arith.constant 0 : index
    %c0_6 = arith.constant 0 : index
    %9 = vector.load %arg4[%c0_5, %c0_6] : memref<8x256xf32, #tpu.memory_space<vmem>>, vector<8x256xf32>
    %cst_7 = arith.constant dense<0.000000e+00> : vector<8x256xf32>
    %10 = tpu.matmul %5, %9, %cst_7 {dimension_numbers = #tpu.dot_dimension_numbers<[1], [0], [0], [1], [0, 0, 1, 1], [], []>} : vector<8x8xf32>, vector<8x256xf32>, vector<8x256xf32> -> vector<8x256xf32>
    %11 = arith.addf %8, %10 : vector<8x256xf32>
    %c0_8 = arith.constant 0 : index
    %c0_9 = arith.constant 0 : index
    %12 = vector.load %arg5[%c0_8, %c0_9] : memref<1x256xf32, #tpu.memory_space<vmem>>, vector<1x256xf32>
    %13 = vector.broadcast %12 : vector<1x256xf32> to vector<8x256xf32>
    %14 = arith.addf %11, %13 : vector<8x256xf32>
    %cst_10 = arith.constant 0.000000e+00 : f32
    %15 = vector.broadcast %cst_10 : f32 to vector<8x256xf32>
    %16 = arith.maximumf %14, %15 : vector<8x256xf32>
    %c0_11 = arith.constant 0 : index
    %c0_12 = arith.constant 0 : index
    %17 = vector.load %arg6[%c0_11, %c0_12] : memref<256x256xf32, #tpu.memory_space<vmem>>, vector<256x256xf32>
    %cst_13 = arith.constant dense<0.000000e+00> : vector<8x256xf32>
    %18 = tpu.matmul %16, %17, %cst_13 {dimension_numbers = #tpu.dot_dimension_numbers<[1], [0], [0], [1], [0, 0, 1, 1], [], []>} : vector<8x256xf32>, vector<256x256xf32>, vector<8x256xf32> -> vector<8x256xf32>
    %c0_14 = arith.constant 0 : index
    %c0_15 = arith.constant 0 : index
    %19 = vector.load %arg7[%c0_14, %c0_15] : memref<1x256xf32, #tpu.memory_space<vmem>>, vector<1x256xf32>
    %20 = vector.broadcast %19 : vector<1x256xf32> to vector<8x256xf32>
    %21 = arith.addf %18, %20 : vector<8x256xf32>
    %cst_16 = arith.constant 0.000000e+00 : f32
    %22 = vector.broadcast %cst_16 : f32 to vector<8x256xf32>
    %23 = arith.maximumf %21, %22 : vector<8x256xf32>
    %c0_17 = arith.constant 0 : index
    %c0_18 = arith.constant 0 : index
    %24 = vector.load %arg8[%c0_17, %c0_18] : memref<256x256xf32, #tpu.memory_space<vmem>>, vector<256x256xf32>
    %cst_19 = arith.constant dense<0.000000e+00> : vector<8x256xf32>
    %25 = tpu.matmul %23, %24, %cst_19 {dimension_numbers = #tpu.dot_dimension_numbers<[1], [0], [0], [1], [0, 0, 1, 1], [], []>} : vector<8x256xf32>, vector<256x256xf32>, vector<8x256xf32> -> vector<8x256xf32>
    %c0_20 = arith.constant 0 : index
    %c0_21 = arith.constant 0 : index
    %26 = vector.load %arg9[%c0_20, %c0_21] : memref<1x256xf32, #tpu.memory_space<vmem>>, vector<1x256xf32>
    %27 = vector.broadcast %26 : vector<1x256xf32> to vector<8x256xf32>
    %28 = arith.addf %25, %27 : vector<8x256xf32>
    %cst_22 = arith.constant 0.000000e+00 : f32
    %29 = vector.broadcast %cst_22 : f32 to vector<8x256xf32>
    %30 = arith.maximumf %28, %29 : vector<8x256xf32>
    %c0_23 = arith.constant 0 : index
    %c0_24 = arith.constant 0 : index
    %31 = vector.load %arg10[%c0_23, %c0_24] : memref<1x256xf32, #tpu.memory_space<vmem>>, vector<1x256xf32>
    %32 = vector.broadcast %31 : vector<1x256xf32> to vector<8x256xf32>
    %33 = arith.mulf %30, %32 : vector<8x256xf32>
    %cst_25 = arith.constant dense<0.000000e+00> : vector<8xf32>
    %34 = vector.multi_reduction <add>, %33, %cst_25 [1] : vector<8x256xf32> to vector<8xf32>
    %35 = vector.shape_cast %34 : vector<8xf32> to vector<8x1xf32>
    %c0_26 = arith.constant 0 : index
    %c0_27 = arith.constant 0 : index
    %36 = vector.load %arg11[%c0_26, %c0_27] : memref<1x1xf32, #tpu.memory_space<vmem>>, vector<1x1xf32>
    %37 = vector.broadcast %36 : vector<1x1xf32> to vector<8x1xf32>
    %38 = arith.addf %35, %37 : vector<8x1xf32>
    %39 = arith.negf %38 : vector<8x1xf32>
    %40 = math.exp %39 : vector<8x1xf32>
    %cst_28 = arith.constant 1.000000e+00 : f32
    %41 = vector.broadcast %cst_28 : f32 to vector<8x1xf32>
    %42 = arith.addf %41, %40 : vector<8x1xf32>
    %43 = arith.divf %41, %42 : vector<8x1xf32>
    %c0_29 = arith.constant 0 : index
    %c0_30 = arith.constant 0 : index
    %44 = vector.load %arg12[%c0_29, %c0_30] : memref<8x1xf32, #tpu.memory_space<vmem>>, vector<8x1xf32>
    tpu.vector_store %arg12[%c0_29, %c0_30], %43 {strides = array<i32>} : memref<8x1xf32, #tpu.memory_space<vmem>>, vector<8x1xf32>,
    return
  }
  func.func @transform_0(%arg0: i32) -> (i32, i32) {
    %c0_i32 = arith.constant 0 : i32
    %c0_i32_0 = arith.constant 0 : i32
    return %arg0, %c0_i32 : i32, i32
  }
  func.func @transform_1(%arg0: i32) -> (i32, i32) {
    %c0_i32 = arith.constant 0 : i32
    %c0_i32_0 = arith.constant 0 : i32
    return %arg0, %c0_i32 : i32, i32
  }
  func.func @transform_2(%arg0: i32) -> (i32, i32) {
    %c0_i32 = arith.constant 0 : i32
    %c0_i32_0 = arith.constant 0 : i32
    %c0_i32_1 = arith.constant 0 : i32
    return %c0_i32, %c0_i32_0 : i32, i32
  }
  func.func @transform_3(%arg0: i32) -> (i32, i32) {
    %c0_i32 = arith.constant 0 : i32
    %c0_i32_0 = arith.constant 0 : i32
    %c0_i32_1 = arith.constant 0 : i32
    return %c0_i32, %c0_i32_0 : i32, i32
  }
  func.func @transform_4(%arg0: i32) -> (i32, i32) {
    %c0_i32 = arith.constant 0 : i32
    %c0_i32_0 = arith.constant 0 : i32
    %c0_i32_1 = arith.constant 0 : i32
    return %c0_i32, %c0_i32_0 : i32, i32
  }
  func.func @transform_5(%arg0: i32) -> (i32, i32) {
    %c0_i32 = arith.constant 0 : i32
    %c0_i32_0 = arith.constant 0 : i32
    %c0_i32_1 = arith.constant 0 : i32
    return %c0_i32, %c0_i32_0 : i32, i32
  }
  func.func @transform_6(%arg0: i32) -> (i32, i32) {
    %c0_i32 = arith.constant 0 : i32
    %c0_i32_0 = arith.constant 0 : i32
    %c0_i32_1 = arith.constant 0 : i32
    return %c0_i32, %c0_i32_0 : i32, i32
  }
  func.func @transform_7(%arg0: i32) -> (i32, i32) {
    %c0_i32 = arith.constant 0 : i32
    %c0_i32_0 = arith.constant 0 : i32
    %c0_i32_1 = arith.constant 0 : i32
    return %c0_i32, %c0_i32_0 : i32, i32
  }
  func.func @transform_8(%arg0: i32) -> (i32, i32) {
    %c0_i32 = arith.constant 0 : i32
    %c0_i32_0 = arith.constant 0 : i32
    %c0_i32_1 = arith.constant 0 : i32
    return %c0_i32, %c0_i32_0 : i32, i32
  }
  func.func @transform_9(%arg0: i32) -> (i32, i32) {
    %c0_i32 = arith.constant 0 : i32
    %c0_i32_0 = arith.constant 0 : i32
    %c0_i32_1 = arith.constant 0 : i32
    return %c0_i32, %c0_i32_0 : i32, i32
  }
  func.func @transform_10(%arg0: i32) -> (i32, i32) {
    %c0_i32 = arith.constant 0 : i32
    %c0_i32_0 = arith.constant 0 : i32
    %c0_i32_1 = arith.constant 0 : i32
    return %c0_i32, %c0_i32_0 : i32, i32
  }
  func.func @transform_11(%arg0: i32) -> (i32, i32) {
    %c0_i32 = arith.constant 0 : i32
    %c0_i32_0 = arith.constant 0 : i32
    return %arg0, %c0_i32 : i32, i32
  }
}

</mosaic_0001>

<bundles_post_ra>
// kernel: shield_forward.1
= control target key start
LH: loop header
LB: loop body
LE: loop exit
PB: predicated region body
PF: predicated region fallthrough
CT: control target
= control target key end

     0   :  { %s1070_s0 = inlined_call_operand.vmem [shape: f32[8,16], index: 0, kind: input, shape index: {}]   ;;  %s1071_s1 = inlined_call_operand.vmem [shape: s32[8,1], index: 1, kind: input, shape index: {}]   ;;  %s1072_s2 = inlined_call_operand.hbm [shape: f32[16,256], index: 2, kind: input, shape index: {}]   ;;  %s1073_s3 = inlined_call_operand.vmem [shape: f32[8,256], index: 3, kind: input, shape index: {}]   ;;  %s1074_s4 = inlined_call_operand.vmem [shape: f32[1,256], index: 4, kind: input, shape index: {}]   ;;  %s1075_s5 = inlined_call_operand.hbm [shape: f32[256,256], index: 5, kind: input, shape index: {}]   ;;  %s1076_s6 = inlined_call_operand.hbm [shape: f32[1,256], index: 6, kind: input, shape index: {}]   ;;  %s1077_s7 = inlined_call_operand.hbm [shape: f32[256,256], index: 7, kind: input, shape index: {}]   ;;  %s1078_s8 = inlined_call_operand.hbm [shape: f32[1,256], index: 8, kind: input, shape index: {}]   ;;  %s1079_s9 = inlined_call_operand.vmem [shape: f32[1,256], index: 9, kind: input, shape index: {}]   ;;  %s1080_s10 = inlined_call_operand.<no memory space> [shape: f32[1,1], index: 10, kind: input, shape index: {}]   ;;  %s1081_s11 = inlined_call_operand.vmem [shape: f32[8,1], index: 11, kind: output, shape index: {}]  }
   0x1   :  { %v16_v0 = vstv %s1080_s10 }
   0x2   :  { %17 = vst [vmem:[#allocation2] sm:$0x1] %v16_v0 }
   0x3   :  { %18 = vsyncpa [#allocation4], 0 }
   0x4   :  { %19 = vsyncpa [#allocation6], 0 }
   0x5   :  { %20 = vsyncpa [#allocation9], 0  ;;  %s893_s19 = smov [#allocation5]   ;;  %s894_s21 = smov [#allocation8]  }
   0x6   :  { %s46_s20 = sshll.u32 %s893_s19, 4  ;;  %s68_s22 = sshll.u32 %s894_s21, 4  ;;  %s47_s20 = int_to_ptr.vmem [resolvable:$true] %s46_s20  ;;  %s965_s22 = int_to_ptr.vmem [resolvable:$true] %s68_s22 }
   0x7   :  { %s777_s25 = scalar_lea.hbm %s1075_s5, 8192 }
   0x8   :  { %p778_p0 = scmp.ne.s32.totalorder %s1075_s5, %s777_s25  ;;  %p781_p1 = scmp.lt.u32.totalorder %s777_s25, %s1075_s5 }
   0xa   :  { %p783_p2 = pnand %p781_p1, %p778_p0 }
   0xc   :  { %786 = shalt.err (!%p783_p2)
}
   0xd   :  { %s787_s29 = scalar_lea.vmem %s47_s20, 8192  ;;  %p792_p4 = scmp.lt.s32.totalorder %s47_s20, %s47_s20 }
   0xe   :  { %p788_p3 = scmp.ne.s32.totalorder %s47_s20, %s787_s29  ;;  %p793_p5 = scmp.lt.s32.totalorder %s787_s29, %s787_s29 }
  0x10   :  { %p794_p6 = por %p793_p5, %p792_p4 }
  0x12   :  { %p795_p7 = pnand %p794_p6, %p788_p3 }
  0x14   :  { %798 = shalt.err (!%p795_p7)
}
  0x15   :  { %s895_s30 = smov 256   ;;  %s896_s12 = smov 16  }
  0x16   :  { %52 = dma.hbm_to_vmem [thread:$0]  %s1075_s5, 8192, %s47_s20, [#allocation6], %s895_s30, %s895_s30, %s896_s12  }
  0x17   :  { %s799_s17 = scalar_lea.hbm %s1077_s7, 8192 }
  0x18   :  { %p800_p8 = scmp.ne.s32.totalorder %s1077_s7, %s799_s17  ;;  %p803_p9 = scmp.lt.u32.totalorder %s799_s17, %s1077_s7 }
  0x1a   :  { %p805_p10 = pnand %p803_p9, %p800_p8 }
  0x1c   :  { %808 = shalt.err (!%p805_p10)
}
  0x1d   :  { %s809_s24 = scalar_lea.vmem %s965_s22, 8192  ;;  %p814_p12 = scmp.lt.s32.totalorder %s965_s22, %s965_s22 }
  0x1e   :  { %p810_p11 = scmp.ne.s32.totalorder %s965_s22, %s809_s24  ;;  %p815_p13 = scmp.lt.s32.totalorder %s809_s24, %s809_s24 }
  0x20   :  { %p816_p0 = por %p815_p13, %p814_p12 }
  0x22   :  { %p817_p1 = pnand %p816_p0, %p810_p11 }
  0x24   :  { %820 = shalt.err (!%p817_p1)
}
  0x25   :  { %74 = dma.hbm_to_vmem [thread:$0]  %s1077_s7, 8192, %s965_s22, [#allocation9], %s895_s30, %s895_s30, %s896_s12  }
  0x26   :  { %s897_s25 = smov [#allocation3]   ;;  %s898_s27 = smov [#allocation7]  }
  0x27   :  { %s30_s26 = sshll.u32 %s897_s25, 4  ;;  %s59_s10 = sshll.u32 %s898_s27, 4  ;;  %s31_s26 = int_to_ptr.vmem [resolvable:$true] %s30_s26  ;;  %s60_s10 = int_to_ptr.vmem [resolvable:$true] %s59_s10 }
  0x28   :  { %s821_s13 = scalar_lea.hbm %s1072_s2, 512 }
  0x29   :  { %p822_p2 = scmp.ne.s32.totalorder %s1072_s2, %s821_s13  ;;  %p825_p3 = scmp.lt.u32.totalorder %s821_s13, %s1072_s2 }
  0x2b   :  { %p827_p4 = pnand %p825_p3, %p822_p2 }
  0x2d   :  { %830 = shalt.err (!%p827_p4)
}
  0x2e   :  { %s831_s7 = scalar_lea.vmem %s31_s26, 512  ;;  %p836_p6 = scmp.lt.s32.totalorder %s31_s26, %s31_s26 }
  0x2f   :  { %p832_p5 = scmp.ne.s32.totalorder %s31_s26, %s831_s7  ;;  %p837_p7 = scmp.lt.s32.totalorder %s831_s7, %s831_s7 }
  0x31   :  { %p838_p8 = por %p837_p7, %p836_p6 }
  0x33   :  { %p839_p9 = pnand %p838_p8, %p832_p5 }
  0x35   :  { %842 = shalt.err (!%p839_p9)
}
  0x36   :  { %36 = dma.hbm_to_vmem [thread:$0]  %s1072_s2, 512, %s31_s26, [#allocation4], %s895_s30, %s895_s30, %s896_s12  }
  0x37   :  { %s843_s23 = scalar_lea.hbm %s1076_s6, 32 }
  0x38   :  { %p844_p10 = scmp.ne.s32.totalorder %s1076_s6, %s843_s23  ;;  %p847_p11 = scmp.lt.u32.totalorder %s843_s23, %s1076_s6 }
  0x3a   :  { %p849_p12 = pnand %p847_p11, %p844_p10 }
  0x3c   :  { %852 = shalt.err (!%p849_p12)
}
  0x3d   :  { %s853_s27 = scalar_lea.vmem %s60_s10, 32  ;;  %p858_p0 = scmp.lt.s32.totalorder %s60_s10, %s60_s10 }
  0x3e   :  { %p854_p13 = scmp.ne.s32.totalorder %s60_s10, %s853_s27  ;;  %p859_p1 = scmp.lt.s32.totalorder %s853_s27, %s853_s27 }
  0x40   :  { %p860_p2 = por %p859_p1, %p858_p0 }
  0x42   :  { %p861_p3 = pnand %p860_p2, %p854_p13 }
  0x44   :  { %864 = shalt.err (!%p861_p3)
}
  0x45   :  { %62 = dma.hbm_to_vmem [thread:$0]  %s1076_s6, 32, %s60_s10, [#allocation6]  }
  0x46   :  { %s899_s12 = smov [#allocation10]   ;;  %s865_s13 = scalar_lea.hbm %s1078_s8, 32 }
  0x47   :  { %s81_s26 = sshll.u32 %s899_s12, 4  ;;  %p866_p4 = scmp.ne.s32.totalorder %s1078_s8, %s865_s13  ;;  %s82_s26 = int_to_ptr.vmem [resolvable:$true] %s81_s26 }
  0x48   :  { %p869_p5 = scmp.lt.u32.totalorder %s865_s13, %s1078_s8 }
  0x4a   :  { %p871_p6 = pnand %p869_p5, %p866_p4 }
  0x4c   :  { %874 = shalt.err (!%p871_p6)
}
  0x4d   :  { %s875_s7 = scalar_lea.vmem %s82_s26, 32  ;;  %p880_p8 = scmp.lt.s32.totalorder %s82_s26, %s82_s26 }
  0x4e   :  { %p876_p7 = scmp.ne.s32.totalorder %s82_s26, %s875_s7  ;;  %p881_p9 = scmp.lt.s32.totalorder %s875_s7, %s875_s7 }
  0x50   :  { %p882_p10 = por %p881_p9, %p880_p8 }
  0x52   :  { %p883_p11 = pnand %p882_p10, %p876_p7 }
  0x54   :  { %886 = shalt.err (!%p883_p11)
}
  0x55   :  { %84 = dma.hbm_to_vmem [thread:$0]  %s1078_s8, 32, %s82_s26, [#allocation9]  }
  0x56   :  { %887 = dma.done.wait [#allocation4], 512  }
  0x57   :  { %888 = vsyncadd [#allocation4], 4294966784 }
  0x58   :  { %889 = dma.done.wait [#allocation6], 8224  }
  0x59   :  { %890 = vsyncadd [#allocation6], 4294959072 }
  0x5a   :  { %891 = dma.done.wait [#allocation9], 8224  }
  0x5b   :  { %892 = vsyncadd [#allocation9], 4294959072  ;;  %v900_v1 = vmov 0   ;;  %v901_v2 = vmov 0.0   ;;  %v106_v3 = vld [vmem:[%s1071_s1] sm:$0xff]  ;;  %v115_v4 = vld [vmem:[#allocation3 + $0x8] sm:$0xff]  ;;  %v104_v16 = vlaneseq }
  0x5c   :  { %772 = vset.pattern.permute.xlu0 %v900_v1  ;;  %263 = vmatprep.mubr.f32.mxu0 %v901_v2  ;;  %v117_v5 = vld [vmem:[#allocation3 + $0x18] sm:$0xff]  ;;  %v114_v7 = vld [vmem:[#allocation3] sm:$0xff]  ;;  %v116_v8 = vld [vmem:[#allocation3 + $0x10] sm:$0xff]  ;;  %vm195_vm0 = vcmask 130048   ;;  %vm120_vm1 = vcmask 64512   ;;  %vm615_vm3 = vcmask 7168  }
  0x5d   :  { %188 = vmatprep.mubr.f32.mxu1 %v901_v2  ;;  %108 = vperm.xlu0 %772, %v106_v3   ;;  %v629_v6 = vpack.c.bf16 %v117_v5, %v115_v4  ;;  %v119_v9 = vld [vmem:[%s1073_s3 + $0x8] sm:$0xff]  ;;  %v631_v10 = vpack.c.bf16 %v116_v8, %v114_v7  ;;  %v118_v11 = vld [vmem:[%s1073_s3] sm:$0xff]  ;;  %v105_v17 = vand.u32 127, %v104_v16  ;;  %v288_v19 = vld [vmem:[#allocation5 + $0x10] sm:$0xff] }
  0x5e   :  { %124 = vmatprep.subr.mxu1 %v119_v9  ;;  %v287_v12 = vld [vmem:[#allocation5 + $0x8] sm:$0xff]  ;;  %v289_v13 = vld [vmem:[#allocation5 + $0x18] sm:$0xff]  ;;  %v286_v18 = vld [vmem:[#allocation5] sm:$0xff] }
  0x5f   :  { %630 = vmatprep.subr.bf16.mxu0 %v629_v6  ;;  %125 = vmatpush1.msra.mxu1 %v118_v11  ;;  %v113_v14 = vld [vmem:[%s1070_s0] sm:$0xff]  ;;  %v633_v15 = vpack.c.bf16 %v289_v13, %v287_v12  ;;  %v291_v20 = vld [vmem:[#allocation5 + $0x28] sm:$0xff]  ;;  %v635_v23 = vpack.c.bf16 %v288_v19, %v286_v18  ;;  %v292_v26 = vld [vmem:[#allocation5 + $0x30] sm:$0xff] }
  0x60   :  { %632 = vmatpush1.bf16.msra.mxu0 %v631_v10  ;;  %v293_v21 = vld [vmem:[#allocation5 + $0x38] sm:$0xff]  ;;  %v290_v25 = vld [vmem:[#allocation5 + $0x20] sm:$0xff]  ;;  %v295_v28 = vld [vmem:[#allocation5 + $0x48] sm:$0xff] }
  0x61   :  { %634 = vmatprep.subr.bf16.mxu1 %v633_v15  ;;  %v637_v24 = vpack.c.bf16 %v293_v21, %v291_v20  ;;  %v297_v29 = vld [vmem:[#allocation5 + $0x58] sm:$0xff]  ;;  %v639_v30 = vpack.c.bf16 %v292_v26, %v290_v25  ;;  %v294_v32 = vld [vmem:[#allocation5 + $0x40] sm:$0xff]  ;;  %v296_v33 = vld [vmem:[#allocation5 + $0x50] sm:$0xff] }
  0x62   :  { %v641_v31 = vpack.c.bf16 %v297_v29, %v295_v28  ;;  %v299_v34 = vld [vmem:[#allocation5 + $0x68] sm:$0xff]  ;;  %v301_v35 = vld [vmem:[#allocation5 + $0x78] sm:$0xff]  ;;  %v643_v36 = vpack.c.bf16 %v296_v33, %v294_v32  ;;  %v298_v38 = vld [vmem:[#allocation5 + $0x60] sm:$0xff] }
  0x63   :  { %626 = vmatmul.mubr.msk.f32.vlgmr.msra.gmra.mrb[0].mxu0 %vm195_vm0, %v113_v14  ;;  %v645_v37 = vpack.c.bf16 %v301_v35, %v299_v34  ;;  %v300_v39 = vld [vmem:[#allocation5 + $0x70] sm:$0xff]  ;;  %v303_v40 = vld [vmem:[#allocation5 + $0x88] sm:$0xff]  ;;  %v305_v41 = vld [vmem:[#allocation5 + $0x98] sm:$0xff] }
  0x64   :  { %v647_v42 = vpack.c.bf16 %v300_v39, %v298_v38  ;;  %v649_v43 = vpack.c.bf16 %v305_v41, %v303_v40  ;;  %v302_v44 = vld [vmem:[#allocation5 + $0x80] sm:$0xff]  ;;  %v304_v45 = vld [vmem:[#allocation5 + $0x90] sm:$0xff]  ;;  %v307_v46 = vld [vmem:[#allocation5 + $0xa8] sm:$0xff] }
  0x65   :  { %v309_v47 = vld [vmem:[#allocation5 + $0xb8] sm:$0xff]  ;;  %v651_v48 = vpack.c.bf16 %v304_v45, %v302_v44  ;;  %v306_v50 = vld [vmem:[#allocation5 + $0xa0] sm:$0xff]  ;;  %v308_v51 = vld [vmem:[#allocation5 + $0xb0] sm:$0xff] }
  0x66   :  { %v653_v49 = vpack.c.bf16 %v309_v47, %v307_v46  ;;  %v311_v52 = vld [vmem:[#allocation5 + $0xc8] sm:$0xff]  ;;  %v313_v53 = vld [vmem:[#allocation5 + $0xd8] sm:$0xff]  ;;  %v655_v54 = vpack.c.bf16 %v308_v51, %v306_v50  ;;  %v310_v56 = vld [vmem:[#allocation5 + $0xc0] sm:$0xff] }
  0x67   :  { %v657_v55 = vpack.c.bf16 %v313_v53, %v311_v52  ;;  %v312_v57 = vld [vmem:[#allocation5 + $0xd0] sm:$0xff]  ;;  %v315_v58 = vld [vmem:[#allocation5 + $0xe8] sm:$0xff]  ;;  %v317_v59 = vld [vmem:[#allocation5 + $0xf8] sm:$0xff] }
  0x68   :  { %v659_v60 = vpack.c.bf16 %v312_v57, %v310_v56  ;;  %v661_v61 = vpack.c.bf16 %v317_v59, %v315_v58  ;;  %v314_v62 = vld [vmem:[#allocation5 + $0xe0] sm:$0xff]  ;;  %v316_v63 = vld [vmem:[#allocation5 + $0xf0] sm:$0xff]  ;;  %v319_v0 = vld [vmem:[#allocation5 + $0x108] sm:$0xff] }
  0x69   :  { %v321_v1 = vld [vmem:[#allocation5 + $0x118] sm:$0xff]  ;;  %v318_v4 = vld [vmem:[#allocation5 + $0x100] sm:$0xff]  ;;  %v320_v5 = vld [vmem:[#allocation5 + $0x110] sm:$0xff] }
  0x6a   :  { %v665_v3 = vpack.c.bf16 %v321_v1, %v319_v0  ;;  %v323_v6 = vld [vmem:[#allocation5 + $0x128] sm:$0xff]  ;;  %v325_v7 = vld [vmem:[#allocation5 + $0x138] sm:$0xff]  ;;  %v667_v8 = vpack.c.bf16 %v320_v5, %v318_v4  ;;  %v322_v10 = vld [vmem:[#allocation5 + $0x120] sm:$0xff] }
  0x6b   :  { %v669_v9 = vpack.c.bf16 %v325_v7, %v323_v6  ;;  %v324_v11 = vld [vmem:[#allocation5 + $0x130] sm:$0xff]  ;;  %v327_v12 = vld [vmem:[#allocation5 + $0x148] sm:$0xff]  ;;  %v329_v13 = vld [vmem:[#allocation5 + $0x158] sm:$0xff] }
  0x6c   :  { %v671_v14 = vpack.c.bf16 %v324_v11, %v322_v10  ;;  %v673_v15 = vpack.c.bf16 %v329_v13, %v327_v12  ;;  %v328_v18 = vld [vmem:[#allocation5 + $0x150] sm:$0xff]  ;;  %v331_v19 = vld [vmem:[#allocation5 + $0x168] sm:$0xff]  ;;  %v333_v20 = vld [vmem:[#allocation5 + $0x178] sm:$0xff] }
  0x6d   :  { %v335_v25 = vld [vmem:[#allocation5 + $0x188] sm:$0xff]  ;;  %v337_v26 = vld [vmem:[#allocation5 + $0x198] sm:$0xff]  ;;  %v334_v29 = vld [vmem:[#allocation5 + $0x180] sm:$0xff] }
  0x6e   :  { %v681_v28 = vpack.c.bf16 %v337_v26, %v335_v25  ;;  %v341_v32 = vld [vmem:[#allocation5 + $0x1b8] sm:$0xff]  ;;  %v338_v35 = vld [vmem:[#allocation5 + $0x1a0] sm:$0xff]  ;;  %v343_v38 = vld [vmem:[#allocation5 + $0x1c8] sm:$0xff] }
  0x6f   :  { %v345_v39 = vld [vmem:[#allocation5 + $0x1d8] sm:$0xff]  ;;  %v342_v41 = vld [vmem:[#allocation5 + $0x1c0] sm:$0xff]  ;;  %v347_v44 = vld [vmem:[#allocation5 + $0x1e8] sm:$0xff] }
  0x70   :  { %v689_v40 = vpack.c.bf16 %v345_v39, %v343_v38  ;;  %v349_v45 = vld [vmem:[#allocation5 + $0x1f8] sm:$0xff]  ;;  %v346_v47 = vld [vmem:[#allocation5 + $0x1e0] sm:$0xff]  ;;  %v436_v52 = vld [vmem:[#allocation8 + $0x8] sm:$0xff] }
  0x71   :  { %v693_v46 = vpack.c.bf16 %v349_v45, %v347_v44  ;;  %v438_v53 = vld [vmem:[#allocation8 + $0x18] sm:$0xff]  ;;  %v437_v56 = vld [vmem:[#allocation8 + $0x10] sm:$0xff]  ;;  %v440_v57 = vld [vmem:[#allocation8 + $0x28] sm:$0xff] }
  0x72   :  { %v442_v58 = vld [vmem:[#allocation8 + $0x38] sm:$0xff]  ;;  %v445_v4 = vld [vmem:[#allocation8 + $0x50] sm:$0xff]  ;;  %v448_v5 = vld [vmem:[#allocation8 + $0x68] sm:$0xff] }
  0x73   :  { %v446_v0 = vld [vmem:[#allocation8 + $0x58] sm:$0xff]  ;;  %v449_v10 = vld [vmem:[#allocation8 + $0x70] sm:$0xff]  ;;  %v452_v11 = vld [vmem:[#allocation8 + $0x88] sm:$0xff] }
  0x74   :  { %v450_v6 = vld [vmem:[#allocation8 + $0x78] sm:$0xff] }
  0x75   :  { %v454_v12 = vld [vmem:[#allocation8 + $0x98] sm:$0xff] }
  0x76   :  { %v462_v25 = vld [vmem:[#allocation8 + $0xd8] sm:$0xff] }
  0xdc   :  { %v109_v22 = vpop.permute.xlu0 %108 }
  0xdd   :  { %vm110_vm2 = vcmp.eq.s32.totalorder %v105_v17, %v109_v22  ;;  %v326_v17 = vld [vmem:[#allocation5 + $0x140] sm:$0xff]  ;;  %v677_v22 = vpack.c.bf16 %v333_v20, %v331_v19 }
  0xde   :  { %v624_v27 = vsel %vm110_vm2, 1.0, %v901_v2  ;;  %v663_v2 = vpack.c.bf16 %v316_v63, %v314_v62  ;;  %v675_v21 = vpack.c.bf16 %v328_v18, %v326_v17  ;;  %v441_v62 = vld [vmem:[#allocation8 + $0x30] sm:$0xff]  ;;  %v444_v63 = vld [vmem:[#allocation8 + $0x48] sm:$0xff]  ;;  %v458_v19 = vld [vmem:[#allocation8 + $0xb8] sm:$0xff] }
  0xdf   :  { %625 = vmatmul.mubr.msk.f32.vlgmr.msra.gmra.mrb[0].mxu1 %vm120_vm1, %v624_v27  ;;  %v453_v17 = vld [vmem:[#allocation8 + $0x90] sm:$0xff]  ;;  %v456_v18 = vld [vmem:[#allocation8 + $0xa8] sm:$0xff] }
  0xe0   :  { %636 = vmatpush1.bf16.msra.mxu1 %v635_v23  ;;  %v330_v23 = vld [vmem:[#allocation5 + $0x160] sm:$0xff] }
  0xe1   :  { %638 = vmatprep.subr.bf16.mxu1 %v637_v24  ;;  %v332_v24 = vld [vmem:[#allocation5 + $0x170] sm:$0xff] }
  0xe2   :  { %v679_v27 = vpack.c.bf16 %v332_v24, %v330_v23  ;;  %v457_v23 = vld [vmem:[#allocation8 + $0xb0] sm:$0xff]  ;;  %v460_v24 = vld [vmem:[#allocation8 + $0xc8] sm:$0xff] }
  0xe4   :  { %640 = vmatpush1.bf16.msra.mxu1 %v639_v30  ;;  %v336_v30 = vld [vmem:[#allocation5 + $0x190] sm:$0xff] }
  0xe5   :  { %642 = vmatprep.subr.bf16.mxu1 %v641_v31  ;;  %v339_v31 = vld [vmem:[#allocation5 + $0x1a8] sm:$0xff]  ;;  %v683_v33 = vpack.c.bf16 %v336_v30, %v334_v29  ;;  %v461_v29 = vld [vmem:[#allocation8 + $0xd0] sm:$0xff] }
  0xe6   :  { %v685_v34 = vpack.c.bf16 %v341_v32, %v339_v31  ;;  %v464_v30 = vld [vmem:[#allocation8 + $0xe8] sm:$0xff]  ;;  %v466_v31 = vld [vmem:[#allocation8 + $0xf8] sm:$0xff] }
  0xe8   :  { %644 = vmatpush1.bf16.msra.mxu1 %v643_v36  ;;  %v340_v36 = vld [vmem:[#allocation5 + $0x1b0] sm:$0xff] }
  0xe9   :  { %646 = vmatprep.subr.bf16.mxu1 %v645_v37  ;;  %v687_v37 = vpack.c.bf16 %v340_v36, %v338_v35  ;;  %v465_v35 = vld [vmem:[#allocation8 + $0xf0] sm:$0xff]  ;;  %v468_v36 = vld [vmem:[#allocation8 + $0x108] sm:$0xff] }
  0xec   :  { %648 = vmatpush1.bf16.msra.mxu1 %v647_v42  ;;  %v344_v42 = vld [vmem:[#allocation5 + $0x1d0] sm:$0xff] }
  0xed   :  { %650 = vmatprep.subr.bf16.mxu1 %v649_v43  ;;  %v691_v43 = vpack.c.bf16 %v344_v42, %v342_v41  ;;  %v469_v41 = vld [vmem:[#allocation8 + $0x110] sm:$0xff]  ;;  %v472_v42 = vld [vmem:[#allocation8 + $0x128] sm:$0xff] }
  0xf0   :  { %652 = vmatpush1.bf16.msra.mxu1 %v651_v48  ;;  %v348_v48 = vld [vmem:[#allocation5 + $0x1f0] sm:$0xff] }
  0xf1   :  { %654 = vmatprep.subr.bf16.mxu1 %v653_v49  ;;  %v695_v50 = vpack.c.bf16 %v348_v48, %v346_v47  ;;  %v473_v47 = vld [vmem:[#allocation8 + $0x130] sm:$0xff]  ;;  %v476_v48 = vld [vmem:[#allocation8 + $0x148] sm:$0xff] }
  0xf4   :  { %656 = vmatpush1.bf16.msra.mxu1 %v655_v54  ;;  %v435_v54 = vld [vmem:[#allocation8] sm:$0xff] }
  0xf5   :  { %658 = vmatprep.subr.bf16.mxu1 %v657_v55  ;;  %v697_v55 = vpack.c.bf16 %v438_v53, %v436_v52  ;;  %v699_v59 = vpack.c.bf16 %v437_v56, %v435_v54  ;;  %v475_v54 = vld [vmem:[#allocation8 + $0x140] sm:$0xff]  ;;  %v480_v56 = vld [vmem:[#allocation8 + $0x168] sm:$0xff] }
  0xf7   :  { %698 = vmatprep.subr.bf16.mxu0 %v697_v55  ;;  %v477_v55 = vld [vmem:[#allocation8 + $0x150] sm:$0xff] }
  0xf8   :  { %660 = vmatpush1.bf16.msra.mxu1 %v659_v60  ;;  %v701_v60 = vpack.c.bf16 %v442_v58, %v440_v57  ;;  %700 = vmatpush1.bf16.msra.mxu0 %v699_v59  ;;  %v482_v57 = vld [vmem:[#allocation8 + $0x178] sm:$0xff]  ;;  %v739_v58 = vpack.c.bf16 %v477_v55, %v475_v54 }
  0xf9   :  { %662 = vmatprep.subr.bf16.mxu1 %v661_v61  ;;  %v439_v61 = vld [vmem:[#allocation8 + $0x20] sm:$0xff]  ;;  %v741_v59 = vpack.c.bf16 %v482_v57, %v480_v56 }
  0xfa   :  { %v703_v1 = vpack.c.bf16 %v441_v62, %v439_v61  ;;  %702 = vmatprep.subr.bf16.mxu0 %v701_v60  ;;  %v479_v60 = vld [vmem:[#allocation8 + $0x160] sm:$0xff]  ;;  %v481_v61 = vld [vmem:[#allocation8 + $0x170] sm:$0xff]  ;;  %v484_v62 = vld [vmem:[#allocation8 + $0x188] sm:$0xff] }
  0xfc   :  { %664 = vmatpush1.bf16.msra.mxu1 %v663_v2  ;;  %v705_v2 = vpack.c.bf16 %v446_v0, %v444_v63  ;;  %704 = vmatpush1.bf16.msra.mxu0 %v703_v1  ;;  %v486_v63 = vld [vmem:[#allocation8 + $0x198] sm:$0xff]  ;;  %v743_v0 = vpack.c.bf16 %v481_v61, %v479_v60 }
  0xfd   :  { %666 = vmatprep.subr.bf16.mxu1 %v665_v3  ;;  %v443_v3 = vld [vmem:[#allocation8 + $0x40] sm:$0xff]  ;;  %v745_v1 = vpack.c.bf16 %v486_v63, %v484_v62  ;;  %v627_v61 = vld [vmem:[#allocation2] ss:$0 sm:$0xff] }
  0xfe   :  { %v707_v7 = vpack.c.bf16 %v445_v4, %v443_v3  ;;  %706 = vmatprep.subr.bf16.mxu0 %v705_v2  ;;  %v483_v2 = vld [vmem:[#allocation8 + $0x180] sm:$0xff]  ;;  %v485_v3 = vld [vmem:[#allocation8 + $0x190] sm:$0xff]  ;;  %v488_v4 = vld [vmem:[#allocation8 + $0x1a8] sm:$0xff] }
 0x100   :  { %668 = vmatpush1.bf16.msra.mxu1 %v667_v8  ;;  %v709_v8 = vpack.c.bf16 %v450_v6, %v448_v5  ;;  %708 = vmatpush1.bf16.msra.mxu0 %v707_v7  ;;  %v490_v5 = vld [vmem:[#allocation8 + $0x1b8] sm:$0xff]  ;;  %v747_v6 = vpack.c.bf16 %v485_v3, %v483_v2 }
 0x101   :  { %670 = vmatprep.subr.bf16.mxu1 %v669_v9  ;;  %v447_v9 = vld [vmem:[#allocation8 + $0x60] sm:$0xff]  ;;  %v749_v7 = vpack.c.bf16 %v490_v5, %v488_v4 }
 0x102   :  { %v711_v13 = vpack.c.bf16 %v449_v10, %v447_v9  ;;  %710 = vmatprep.subr.bf16.mxu0 %v709_v8  ;;  %v487_v8 = vld [vmem:[#allocation8 + $0x1a0] sm:$0xff]  ;;  %v489_v9 = vld [vmem:[#allocation8 + $0x1b0] sm:$0xff]  ;;  %v492_v10 = vld [vmem:[#allocation8 + $0x1c8] sm:$0xff] }
 0x104   :  { %672 = vmatpush1.bf16.msra.mxu1 %v671_v14  ;;  %v713_v14 = vpack.c.bf16 %v454_v12, %v452_v11  ;;  %712 = vmatpush1.bf16.msra.mxu0 %v711_v13  ;;  %v494_v11 = vld [vmem:[#allocation8 + $0x1d8] sm:$0xff]  ;;  %v751_v12 = vpack.c.bf16 %v489_v9, %v487_v8 }
 0x105   :  { %674 = vmatprep.subr.bf16.mxu1 %v673_v15  ;;  %v451_v15 = vld [vmem:[#allocation8 + $0x80] sm:$0xff]  ;;  %v753_v13 = vpack.c.bf16 %v494_v11, %v492_v10 }
 0x106   :  { %v715_v20 = vpack.c.bf16 %v453_v17, %v451_v15  ;;  %714 = vmatprep.subr.bf16.mxu0 %v713_v14  ;;  %v273_v14 = vshrl.u32 %v104_v16, 7  ;;  %v491_v16 = vld [vmem:[#allocation8 + $0x1c0] sm:$0xff] }
 0x108   :  { %676 = vmatpush1.bf16.msra.mxu1 %v675_v21  ;;  %v717_v21 = vpack.c.bf16 %v458_v19, %v456_v18  ;;  %716 = vmatpush1.bf16.msra.mxu0 %v715_v20  ;;  %v274_v15 = vsub.s32 0, %v273_v14  ;;  %v278_v17 = vsub.s32 1, %v273_v14  ;;  %v270_v18 = vld [vmem:[%s1074_s4] sm:$0x3] }
 0x109   :  { %678 = vmatprep.subr.bf16.mxu1 %v677_v22  ;;  %v455_v22 = vld [vmem:[#allocation8 + $0xa0] sm:$0xff] }
 0x10a   :  { %v719_v26 = vpack.c.bf16 %v457_v23, %v455_v22  ;;  %718 = vmatprep.subr.bf16.mxu0 %v717_v21  ;;  %v275_v19 = vrot.slane %v270_v18, %v274_v15  ;;  %v279_v21 = vrot.slane %v270_v18, %v278_v17 }
 0x10c   :  { %680 = vmatpush1.bf16.msra.mxu1 %v679_v27  ;;  %v721_v27 = vpack.c.bf16 %v462_v25, %v460_v24  ;;  %720 = vmatpush1.bf16.msra.mxu0 %v719_v26 }
 0x10d   :  { %682 = vmatprep.subr.bf16.mxu1 %v681_v28  ;;  %v459_v28 = vld [vmem:[#allocation8 + $0xc0] sm:$0xff] }
 0x10e   :  { %v723_v32 = vpack.c.bf16 %v461_v29, %v459_v28  ;;  %722 = vmatprep.subr.bf16.mxu0 %v721_v27  ;;  %v493_v29 = vld [vmem:[#allocation8 + $0x1d0] sm:$0xff] }
 0x110   :  { %684 = vmatpush1.bf16.msra.mxu1 %v683_v33  ;;  %v725_v33 = vpack.c.bf16 %v466_v31, %v464_v30  ;;  %724 = vmatpush1.bf16.msra.mxu0 %v723_v32  ;;  %v755_v30 = vpack.c.bf16 %v493_v29, %v491_v16  ;;  %v496_v31 = vld [vmem:[#allocation8 + $0x1e8] sm:$0xff]  ;;  %v498_v32 = vld [vmem:[#allocation8 + $0x1f8] sm:$0xff] }
 0x111   :  { %686 = vmatprep.subr.bf16.mxu1 %v685_v34  ;;  %v463_v34 = vld [vmem:[#allocation8 + $0xe0] sm:$0xff] }
 0x112   :  { %v727_v38 = vpack.c.bf16 %v465_v35, %v463_v34  ;;  %726 = vmatprep.subr.bf16.mxu0 %v725_v33  ;;  %v757_v33 = vpack.c.bf16 %v498_v32, %v496_v31  ;;  %v495_v34 = vld [vmem:[#allocation8 + $0x1e0] sm:$0xff]  ;;  %v497_v35 = vld [vmem:[#allocation8 + $0x1f0] sm:$0xff] }
 0x114   :  { %688 = vmatpush1.bf16.msra.mxu1 %v687_v37  ;;  %v470_v37 = vld [vmem:[#allocation8 + $0x118] sm:$0xff]  ;;  %728 = vmatpush1.bf16.msra.mxu0 %v727_v38 }
 0x115   :  { %690 = vmatprep.subr.bf16.mxu1 %v689_v40  ;;  %v729_v39 = vpack.c.bf16 %v470_v37, %v468_v36  ;;  %v467_v40 = vld [vmem:[#allocation8 + $0x100] sm:$0xff]  ;;  %v759_v36 = vpack.c.bf16 %v497_v35, %v495_v34 }
 0x116   :  { %v731_v44 = vpack.c.bf16 %v469_v41, %v467_v40 }
 0x117   :  { %730 = vmatprep.subr.bf16.mxu0 %v729_v39 }
 0x118   :  { %692 = vmatpush1.bf16.msra.mxu1 %v691_v43  ;;  %v474_v43 = vld [vmem:[#allocation8 + $0x138] sm:$0xff]  ;;  %732 = vmatpush1.bf16.msra.mxu0 %v731_v44  ;;  %v499_v44 = vld [vmem:[#allocation10] sm:$0x3] }
 0x119   :  { %694 = vmatprep.subr.bf16.mxu1 %v693_v46  ;;  %v733_v45 = vpack.c.bf16 %v474_v43, %v472_v42  ;;  %v471_v46 = vld [vmem:[#allocation8 + $0x120] sm:$0xff] }
 0x11a   :  { %v735_v52 = vpack.c.bf16 %v473_v47, %v471_v46  ;;  %v584_v46 = vld [vmem:[%s1079_s9] sm:$0x3]  ;;  %v508_v47 = vrot.slane %v499_v44, %v278_v17 }
 0x11b   :  { %734 = vmatprep.subr.bf16.mxu0 %v733_v45  ;;  %v504_v45 = vrot.slane %v499_v44, %v274_v15  ;;  %v593_v55 = vrot.slane %v584_v46, %v278_v17 }
 0x11c   :  { %696 = vmatpush1.bf16.msra.mxu1 %v695_v50  ;;  %v478_v50 = vld [vmem:[#allocation8 + $0x158] sm:$0xff]  ;;  %736 = vmatpush1.bf16.msra.mxu0 %v735_v52  ;;  %v589_v52 = vrot.slane %v584_v46, %v274_v15 }
 0x11d   :  { %v737_v53 = vpack.c.bf16 %v478_v50, %v476_v48 }
 0x11f   :  { %738 = vmatprep.subr.bf16.mxu0 %v737_v53 }
 0x120   :  { %740 = vmatpush1.bf16.msra.mxu0 %v739_v58 }
 0x121   :  { %742 = vmatprep.subr.bf16.mxu0 %v741_v59 }
 0x124   :  { %744 = vmatpush1.bf16.msra.mxu0 %v743_v0 }
 0x125   :  { %746 = vmatprep.subr.bf16.mxu0 %v745_v1 }
 0x128   :  { %748 = vmatpush1.bf16.msra.mxu0 %v747_v6 }
 0x129   :  { %750 = vmatprep.subr.bf16.mxu0 %v749_v7 }
 0x12c   :  { %752 = vmatpush1.bf16.msra.mxu0 %v751_v12 }
 0x12d   :  { %754 = vmatprep.subr.bf16.mxu0 %v753_v13 }
 0x130   :  { %756 = vmatpush1.bf16.msra.mxu0 %v755_v30 }
 0x131   :  { %758 = vmatprep.subr.bf16.mxu0 %v757_v33 }
 0x134   :  { %760 = vmatpush1.bf16.msra.mxu0 %v759_v36 }
 0x136   :  { %v1054_v49 = vpop.f32.mrb[0].mxu0 }
 0x137   :  { %v1056_v51 = vpop.f32.mrb[1].mxu0 }
 0x1b2   :  { %v190_v20 = vpop.f32.mrb[0].mxu1 }
 0x1b3   :  { %v266_v22 = vadd.f32 %v1054_v49, %v190_v20  ;;  %v192_v23 = vpop.f32.mrb[1].mxu1  ;;  %v350_v49 = vld [vmem:[#allocation7] sm:$0x3] }
 0x1b4   :  { %v268_v24 = vadd.f32 %v1056_v51, %v192_v23  ;;  %v355_v51 = vrot.slane %v350_v49, %v274_v15  ;;  %v359_v37 = vrot.slane %v350_v49, %v278_v17 }
 0x1b5   :  { %v282_v25 = vadd.f32 %v275_v19, %v266_v22 }
 0x1b6   :  { %v283_v26 = vadd.f32 %v279_v21, %v268_v24 }
 0x1b7   :  { %v284_v28 = vmax.f32 %v282_v25, 0.0 }
 0x1b8   :  { %v285_v27 = vmax.f32 %v283_v26, 0.0 }
 0x1ba   :  { %426 = vmatprep.mubr.f32.mxu1 %v285_v27 }
 0x1bb   :  { %427 = vmatmul.mubr.f32.vlgmr.msra.gmra.mrb[2].mxu1 %v284_v28 }
 0x28e   :  { %v428_v38 = vpop.f32.mrb[2].mxu1 }
 0x28f   :  { %v429_v39 = vadd.f32 %v428_v38, %v355_v51  ;;  %v430_v40 = vpop.f32.mrb[3].mxu1 }
 0x290   :  { %v431_v41 = vadd.f32 %v430_v40, %v359_v37 }
 0x291   :  { %v433_v43 = vmax.f32 %v429_v39, 0.0 }
 0x292   :  { %v434_v42 = vmax.f32 %v431_v41, 0.0 }
 0x294   :  { %575 = vmatprep.mubr.f32.mxu0 %v434_v42 }
 0x295   :  { %576 = vmatmul.mubr.f32.vlgmr.msra.gmra.mrb[2].mxu0 %v433_v43 }
 0x368   :  { %v577_v48 = vpop.f32.mrb[2].mxu0 }
 0x369   :  { %v578_v50 = vadd.f32 %v577_v48, %v504_v45  ;;  %v579_v53 = vpop.f32.mrb[3].mxu0 }
 0x36a   :  { %v580_v54 = vadd.f32 %v579_v53, %v508_v47 }
 0x36b   :  { %v582_v56 = vmax.f32 %v578_v50, 0.0 }
 0x36c   :  { %v583_v57 = vmax.f32 %v580_v54, 0.0 }
 0x36d   :  { %v596_v58 = vmul.f32 %v589_v52, %v582_v56 }
 0x36e   :  { %v597_v59 = vmul.f32 %v593_v55, %v583_v57 }
 0x370   :  { %v598_v60 = vadd.f32 %v597_v59, %v596_v58 }
 0x372   :  { %599 = vadd.xlane.f32.xlu0 %v598_v60 }
 0x3ff   :  { %v600_v62 = vpop.xlane.xlu0 %599 }
 0x400   :  { %v608_v63 = vadd.f32 %v627_v61, %v600_v62 }
 0x402   :  { %v628_v0 = vmul.f32 -1.442695, %v608_v63 }
 0x404   :  { %773 = vpow2.f32 %v628_v0 }
 0x40e   :  { %v774_v1 = vpop.eup %773 }
 0x40f   :  { %v612_v2 = vadd.f32 1.0, %v774_v1 }
 0x411   :  { %775 = vrcp.f32 %v612_v2 }
 0x41b   :  { %v776_v3 = vpop.eup %775 }
 0x41c   :  { %616 = vst.msk [vmem:[%s1081_s11] sm:$0xff] %vm615_vm3, %v776_v3 }
 0x41d   :  { %621 = vsyncpa [#allocation4], 1 }
 0x41e   :  { %622 = vsyncpa [#allocation6], 1 }
 0x41f   :  { %623 = vsyncpa [#allocation9], 1 }

</bundles_post_ra>
